<compile_context>
chip_gen: v7x
topology: tpu7x:2x2x1
jax: 0.10.0
libtpu: 0.0.40
codegen_flags: <defaults>
</compile_context>

<pallas_src>
import functools

import jax
import jax.numpy as jnp
import numpy as np
from jax import lax
from jax.experimental import pallas as pl
from jax.experimental.pallas import tpu as pltpu


def _round_up(x, m):
    return (x + m - 1) // m * m


@functools.lru_cache(maxsize=1)
def _is_v5e():
    try:
        kind = jax.devices()[0].device_kind.lower()
    except Exception:
        return False
    return ("v5 lite" in kind) or ("v5e" in kind) or ("v5litepod" in kind)


def _pick_tq(bp):
    tq = 128 if _is_v5e() else 256
    if bp % tq != 0:
        tq = 128
    return min(tq, bp)


def _compiler_params(bp, dp, tq):
    # Generous per-step estimate: resident full emb (<=2 bufs), double-buffered
    # row tile, ~8 live (Tq,Bp) f32 temporaries, tiny vectors.
    est = (2 * bp * dp * 2
           + 2 * tq * dp * 2
           + 4 * bp * 4
           + 8 * tq * bp * 4
           + 8 * tq * 8)
    try:
        cap = int(pltpu.get_tpu_info().vmem_capacity_bytes)
    except Exception:
        cap = 64 << 20                      # conservative fallback (v7x-sized)
    limit = int(min(int(cap * 0.8), max(32 << 20, est + (16 << 20))))
    return pltpu.CompilerParams(
        dimension_semantics=("parallel",),
        vmem_limit_bytes=limit)


def _triplet_rows_kernel(emb_tile_ref, emb_full_ref, sqrow_ref,
                         pidc_ref, pidr_ref, out_ref, *, real_b):
    """Per-row-tile batch-hard soft-margin triplet loss (per-sample values)."""
    xt = emb_tile_ref[...]                               # (Tq, Dp) bf16
    xf = emb_full_ref[...]                               # (Bp, Dp) bf16 (resident)
    tq = xt.shape[0]
    bp = xf.shape[0]

    # Gram block on the MXU, contracting the LAST dims of both operands
    # (x_tile @ x_full^T without a transposed copy); bf16 in, f32 acc.
    gram = lax.dot_general(xt, xf, (((1,), (1,)), ((), ())),
                           preferred_element_type=jnp.float32)      # (Tq, Bp)

    # Squared norms straight from the embeddings (no masked-diagonal passes).
    xt32 = xt.astype(jnp.float32)
    sq_col = jnp.sum(xt32 * xt32, axis=1, keepdims=True)            # (Tq, 1)
    sq_row = sqrow_ref[...]                                         # (1, Bp)

    d2 = sq_col + sq_row - 2.0 * gram                               # (Tq, Bp)

    row0 = pl.program_id(0) * tq
    row = row0 + lax.broadcasted_iota(jnp.int32, (tq, bp), 0)
    col = lax.broadcasted_iota(jnp.int32, (tq, bp), 1)
    diag = row == col
    valid = jnp.logical_and(row < real_b, col < real_b)             # pad mask
    same = pidc_ref[...] == pidr_ref[...]                           # (Tq, Bp)

    NEG = jnp.float32(-1e30)
    POS = jnp.float32(1e30)

    # Batch-hard mining on squared distances (sqrt is monotone), sentinels
    # fused into the where's; sqrt only on the reduced (Tq,1) vectors.
    fp2 = jnp.max(jnp.where(same & (~diag) & valid, d2, NEG),
                  axis=1, keepdims=True)                            # (Tq, 1)
    cn2 = jnp.min(jnp.where((~same) & valid, d2, POS),
                  axis=1, keepdims=True)                            # (Tq, 1)
    furthest_pos = jnp.where(fp2 > -1e29,
                             jnp.sqrt(jnp.maximum(fp2, 1e-12)), NEG)
    closest_neg = jnp.where(cn2 < 1e29,
                            jnp.sqrt(jnp.maximum(cn2, 1e-12)), POS)

    diff = furthest_pos - closest_neg
    # softplus(diff), numerically stable; padded / degenerate rows give ~0.
    per_sample = jnp.maximum(diff, 0.0) + jnp.log1p(jnp.exp(-jnp.abs(diff)))
    out_ref[...] = per_sample                                       # (Tq, 1)


@functools.partial(jax.jit, static_argnums=(0, 1, 2))
def _dynamic_focal_call(alpha, gamma, p0, state, emb, pids):
    real_b, d = emb.shape
    bp = _round_up(max(real_b, 1), 128)        # lane-dense N dim everywhere
    dp = _round_up(d, 128)
    tq = _pick_tq(bp)
    n_tiles = bp // tq

    # bf16 embeddings (MXU-native, half the resident VMEM / DMA bytes); the
    # padded rows/cols are masked out in-kernel via the static real batch size.
    # TODO(synk): bf16 Gram can flip the batch-hard argmax/argmin for pairs
    # closer than ~1e-2 relative; switch the dot to f32 inputs if that matters.
    xb = jnp.pad(emb, ((0, bp - real_b), (0, dp - d))).astype(jnp.bfloat16)
    x32 = xb.astype(jnp.float32)
    sq_row = jnp.sum(x32 * x32, axis=1).reshape(1, bp)              # (1, Bp)

    pid = jnp.pad(pids.astype(jnp.int32), (0, bp - real_b), constant_values=-1)
    pid_col = pid.reshape(bp, 1)
    pid_row = pid.reshape(1, bp)

    kernel = functools.partial(_triplet_rows_kernel, real_b=int(real_b))

    per_sample = pl.pallas_call(
        kernel,
        out_shape=jax.ShapeDtypeStruct((bp, 1), jnp.float32),
        grid=(n_tiles,),
        in_specs=[
            pl.BlockSpec((tq, dp), lambda i: (i, 0)),   # emb row tile
            pl.BlockSpec((bp, dp), lambda i: (0, 0)),   # full emb (resident)
            pl.BlockSpec((1, bp), lambda i: (0, 0)),    # squared-norm row
            pl.BlockSpec((tq, 1), lambda i: (i, 0)),    # pid column tile
            pl.BlockSpec((1, bp), lambda i: (0, 0)),    # pid row (resident)
        ],
        out_specs=pl.BlockSpec((tq, 1), lambda i: (i, 0)),
        compiler_params=_compiler_params(bp, dp, tq),
    )(xb, xb, sq_row, pid_col, pid_row)

    # ---- loss = torch.mean(loss) over the REAL batch (padded rows are 0) ----
    loss = jnp.sum(per_sample) * (1.0 / float(real_b))

    # ---- dynamic-focal bookkeeping (the torch.no_grad() block), on device ----
    k_old = state[0]
    has_k = state[1]
    k_old_safe = jnp.where(has_k > 0.5, k_old, 1.0)
    k_new = jnp.where(has_k > 0.5, alpha * loss + (1.0 - alpha) * k_old, loss)
    p = jnp.where(has_k > 0.5, jnp.minimum(k_new, k_old) / k_old_safe,
                  jnp.float32(p0))
    p = jnp.maximum(p, 1e-12)
    fl = -jnp.power(jnp.maximum(1.0 - p, 0.0), gamma) * jnp.log(p)

    new_state = jnp.stack([k_new, jnp.float32(1.0)])
    return loss, fl, new_state


class DynamicFocalLoss:
    """JAX/Pallas port of DynamicFocalLoss(WeightedLoss)."""

    def __init__(self, alpha, gamma, p0, name="triplet"):
        self.alpha = float(alpha)
        self.gamma = float(gamma)
        self.p0 = float(p0)
        self.name = name
        # Device-resident [k, has_k]; never synced to host on the training path.
        self._state = jnp.zeros((2,), dtype=jnp.float32)
        # TODO(synk): tensorboard_logger.add_scalar has no Pallas equivalent
        # (host-side logging side effect) -- intentionally omitted.

    @property
    def k(self):
        """Host view of the loss EMA (forces a sync; tests/inspection only)."""
        st = np.asarray(jax.device_get(self._state))
        return None if st[1] < 0.5 else float(st[0])

    def forward(self, endpoints, data):
        # TODO(synk): forward-only; a pure-JAX backward / custom_vjp would be
        # needed before differentiating through this loss with jax.grad.
        loss, fl, self._state = _dynamic_focal_call(
            self.alpha, self.gamma, self.p0,
            self._state, endpoints["emb"], data["pids"])
        return loss, fl


# ---------------------------- pure-JAX reference ----------------------------
def _reference(emb, pids, alpha, gamma, p0, k_old, has_k):
    xb = emb.astype(jnp.bfloat16)
    x32 = xb.astype(jnp.float32)
    gram = jnp.dot(xb, xb.T, preferred_element_type=jnp.float32)
    sq = jnp.sum(x32 * x32, axis=1)
    d2 = sq[:, None] + sq[None, :] - 2.0 * gram
    dist = jnp.sqrt(jnp.maximum(d2, 1e-12))
    same = pids[:, None] == pids[None, :]
    eye = jnp.eye(emb.shape[0], dtype=bool)
    fpos = jnp.max(jnp.where(same & ~eye, dist, -1e30), axis=1)
    cneg = jnp.min(jnp.where(~same, dist, 1e30), axis=1)
    diff = fpos - cneg
    per = jnp.maximum(diff, 0.0) + jnp.log1p(jnp.exp(-jnp.abs(diff)))
    loss = jnp.mean(per)
    if not has_k:
        k_new, p = loss, jnp.float32(p0)
    else:
        k_new = alpha * loss + (1.0 - alpha) * k_old
        p = jnp.minimum(k_new, k_old) / k_old
    p = jnp.maximum(p, 1e-12)
    fl = -jnp.power(jnp.maximum(1.0 - p, 0.0), gamma) * jnp.log(p)
    return loss, fl, k_new


if __name__ == "__main__":
    key = jax.random.PRNGKey(0)
    B, D = 8, 32                          # 4 identities x 2 samples each
    emb = jax.random.normal(key, (B, D), dtype=jnp.float32)
    pids = jnp.array([0, 0, 1, 1, 2, 2, 3, 3], dtype=jnp.int32)

    dfl = DynamicFocalLoss(alpha=0.5, gamma=2.0, p0=0.9, name="triplet")
    endpoints, data = {"emb": emb}, {"pids": pids}

    # first call: self.k is None branch (p = p0)
    loss1, fl1 = dfl.forward(endpoints, data)
    jax.block_until_ready((loss1, fl1))
    ref_l1, ref_f1, ref_k1 = _reference(emb, pids, 0.5, 2.0, 0.9, 0.0, False)
    np.testing.assert_allclose(np.asarray(loss1), np.asarray(ref_l1),
                               rtol=1e-4, atol=1e-5)
    np.testing.assert_allclose(np.asarray(fl1), np.asarray(ref_f1),
                               rtol=1e-4, atol=1e-5)
    k1 = dfl.k
    np.testing.assert_allclose(k1, float(ref_k1), rtol=1e-4, atol=1e-5)

    # second call: EMA branch (k already set, stays on device)
    emb2 = emb * 1.1
    loss2, fl2 = dfl.forward({"emb": emb2}, data)
    jax.block_until_ready((loss2, fl2))
    ref_l2, ref_f2, ref_k2 = _reference(emb2, pids, 0.5, 2.0, 0.9, k1, True)
    np.testing.assert_allclose(np.asarray(loss2), np.asarray(ref_l2),
                               rtol=1e-4, atol=1e-5)
    np.testing.assert_allclose(np.asarray(fl2), np.asarray(ref_f2),
                               rtol=1e-4, atol=1e-5)
    np.testing.assert_allclose(dfl.k, float(ref_k2), rtol=1e-4, atol=1e-5)

    print("KERNEL_OK")
</pallas_src>

<mosaic_0001>
module attributes {stable_mosaic.version = 11 : i64} {
  func.func @_triplet_rows_kernel(%arg0: i32, %arg1: memref<128x128xbf16, #tpu.memory_space<vmem>>, %arg2: memref<128x128xbf16, #tpu.memory_space<vmem>>, %arg3: memref<1x128xf32, #tpu.memory_space<vmem>>, %arg4: memref<128x1xi32, #tpu.memory_space<vmem>>, %arg5: memref<1x128xi32, #tpu.memory_space<vmem>>, %arg6: memref<128x1xf32, #tpu.memory_space<vmem>>) attributes {dimension_semantics = [#tpu.dimension_semantics<parallel>], iteration_bounds = array<i64: 1>, scalar_prefetch = 0 : i64, scratch_operands = 0 : i64, tpu.core_type = #tpu.core_type<tc>, window_params = [{transform_indices = @transform_0, window_bounds = array<i64: 128, 128>}, {pipeline_mode = #tpu.pipeline_mode<synchronous>, transform_indices = @transform_1, window_bounds = array<i64: 128, 128>}, {pipeline_mode = #tpu.pipeline_mode<synchronous>, transform_indices = @transform_2, window_bounds = array<i64: 1, 128>}, {transform_indices = @transform_3, window_bounds = array<i64: 128, 1>}, {pipeline_mode = #tpu.pipeline_mode<synchronous>, transform_indices = @transform_4, window_bounds = array<i64: 1, 128>}, {transform_indices = @transform_5, window_bounds = array<i64: 128, 1>}]} {
    %c0 = arith.constant 0 : index
    %c0_0 = arith.constant 0 : index
    %0 = vector.load %arg1[%c0, %c0_0] : memref<128x128xbf16, #tpu.memory_space<vmem>>, vector<128x128xbf16>
    %c0_1 = arith.constant 0 : index
    %c0_2 = arith.constant 0 : index
    %1 = vector.load %arg2[%c0_1, %c0_2] : memref<128x128xbf16, #tpu.memory_space<vmem>>, vector<128x128xbf16>
    %cst = arith.constant dense<0.000000e+00> : vector<128x128xf32>
    %2 = tpu.matmul %0, %1, %cst {dimension_numbers = #tpu.dot_dimension_numbers<[1], [1], [0], [0], [0, 0, 1, 0], [], []>} : vector<128x128xbf16>, vector<128x128xbf16>, vector<128x128xf32> -> vector<128x128xf32>
    %3 = arith.extf %0 : vector<128x128xbf16> to vector<128x128xf32>
    %4 = arith.mulf %3, %3 : vector<128x128xf32>
    %cst_3 = arith.constant dense<0.000000e+00> : vector<128xf32>
    %5 = vector.multi_reduction <add>, %4, %cst_3 [1] : vector<128x128xf32> to vector<128xf32>
    %6 = vector.shape_cast %5 : vector<128xf32> to vector<128x1xf32>
    %c0_4 = arith.constant 0 : index
    %c0_5 = arith.constant 0 : index
    %7 = vector.load %arg3[%c0_4, %c0_5] : memref<1x128xf32, #tpu.memory_space<vmem>>, vector<1x128xf32>
    %8 = vector.broadcast %6 : vector<128x1xf32> to vector<128x128xf32>
    %9 = vector.broadcast %7 : vector<1x128xf32> to vector<128x128xf32>
    %10 = arith.addf %8, %9 : vector<128x128xf32>
    %cst_6 = arith.constant 2.000000e+00 : f32
    %11 = vector.broadcast %cst_6 : f32 to vector<128x128xf32>
    %12 = arith.mulf %11, %2 : vector<128x128xf32>
    %13 = arith.subf %10, %12 : vector<128x128xf32>
    %c128_i32 = arith.constant 128 : i32
    %14 = arith.muli %arg0, %c128_i32 : i32
    %15 = tpu.iota {dimensions = array<i32: 0>} : vector<128x128xi32>
    %16 = vector.broadcast %14 : i32 to vector<128x128xi32>
    %17 = arith.addi %16, %15 : vector<128x128xi32>
    %18 = tpu.iota {dimensions = array<i32: 1>} : vector<128x128xi32>
    %19 = arith.cmpi eq, %17, %18 : vector<128x128xi32>
    %c8_i32 = arith.constant 8 : i32
    %20 = vector.broadcast %c8_i32 : i32 to vector<128x128xi32>
    %21 = arith.cmpi slt, %17, %20 : vector<128x128xi32>
    %c8_i32_7 = arith.constant 8 : i32
    %22 = vector.broadcast %c8_i32_7 : i32 to vector<128x128xi32>
    %23 = arith.cmpi slt, %18, %22 : vector<128x128xi32>
    %24 = arith.andi %21, %23 : vector<128x128xi1>
    %c0_8 = arith.constant 0 : index
    %c0_9 = arith.constant 0 : index
    %25 = vector.load %arg4[%c0_8, %c0_9] : memref<128x1xi32, #tpu.memory_space<vmem>>, vector<128x1xi32>
    %c0_10 = arith.constant 0 : index
    %c0_11 = arith.constant 0 : index
    %26 = vector.load %arg5[%c0_10, %c0_11] : memref<1x128xi32, #tpu.memory_space<vmem>>, vector<1x128xi32>
    %27 = vector.broadcast %25 : vector<128x1xi32> to vector<128x128xi32>
    %28 = vector.broadcast %26 : vector<1x128xi32> to vector<128x128xi32>
    %29 = arith.cmpi eq, %27, %28 : vector<128x128xi32>
    %cst_12 = arith.constant dense<true> : vector<128x128xi1>
    %30 = arith.xori %19, %cst_12 : vector<128x128xi1>
    %31 = arith.andi %29, %30 : vector<128x128xi1>
    %32 = arith.andi %31, %24 : vector<128x128xi1>
    %cst_13 = arith.constant -1.000000e+30 : f32
    %33 = vector.broadcast %cst_13 : f32 to vector<128x128xf32>
    %34 = arith.select %32, %13, %33 : vector<128x128xi1>, vector<128x128xf32>
    %cst_14 = arith.constant dense<0xFF800000> : vector<128xf32>
    %35 = vector.multi_reduction <maximumf>, %34, %cst_14 [1] : vector<128x128xf32> to vector<128xf32>
    %36 = vector.shape_cast %35 : vector<128xf32> to vector<128x1xf32>
    %cst_15 = arith.constant dense<true> : vector<128x128xi1>
    %37 = arith.xori %29, %cst_15 : vector<128x128xi1>
    %38 = arith.andi %37, %24 : vector<128x128xi1>
    %cst_16 = arith.constant 1.000000e+30 : f32
    %39 = vector.broadcast %cst_16 : f32 to vector<128x128xf32>
    %40 = arith.select %38, %13, %39 : vector<128x128xi1>, vector<128x128xf32>
    %cst_17 = arith.constant dense<0x7F800000> : vector<128xf32>
    %41 = vector.multi_reduction <minimumf>, %40, %cst_17 [1] : vector<128x128xf32> to vector<128xf32>
    %42 = vector.shape_cast %41 : vector<128xf32> to vector<128x1xf32>
    %cst_18 = arith.constant -1.000000e+29 : f32
    %43 = vector.broadcast %cst_18 : f32 to vector<128x1xf32>
    %44 = arith.cmpf ogt, %36, %43 : vector<128x1xf32>
    %cst_19 = arith.constant 9.99999996E-13 : f32
    %45 = vector.broadcast %cst_19 : f32 to vector<128x1xf32>
    %46 = arith.maximumf %36, %45 : vector<128x1xf32>
    %47 = math.sqrt %46 : vector<128x1xf32>
    %cst_20 = arith.constant -1.000000e+30 : f32
    %48 = vector.broadcast %cst_20 : f32 to vector<128x1xf32>
    %49 = arith.select %44, %47, %48 : vector<128x1xi1>, vector<128x1xf32>
    %cst_21 = arith.constant 1.000000e+29 : f32
    %50 = vector.broadcast %cst_21 : f32 to vector<128x1xf32>
    %51 = arith.cmpf olt, %42, %50 : vector<128x1xf32>
    %cst_22 = arith.constant 9.99999996E-13 : f32
    %52 = vector.broadcast %cst_22 : f32 to vector<128x1xf32>
    %53 = arith.maximumf %42, %52 : vector<128x1xf32>
    %54 = math.sqrt %53 : vector<128x1xf32>
    %cst_23 = arith.constant 1.000000e+30 : f32
    %55 = vector.broadcast %cst_23 : f32 to vector<128x1xf32>
    %56 = arith.select %51, %54, %55 : vector<128x1xi1>, vector<128x1xf32>
    %57 = arith.subf %49, %56 : vector<128x1xf32>
    %cst_24 = arith.constant 0.000000e+00 : f32
    %58 = vector.broadcast %cst_24 : f32 to vector<128x1xf32>
    %59 = arith.maximumf %57, %58 : vector<128x1xf32>
    %60 = math.absf %57 : vector<128x1xf32>
    %cst_25 = arith.constant 0.000000e+00 : f32
    %61 = vector.broadcast %cst_25 : f32 to vector<128x1xf32>
    %62 = arith.subf %61, %60 : vector<128x1xf32>
    %63 = math.exp %62 : vector<128x1xf32>
    %64 = math.log1p %63 : vector<128x1xf32>
    %65 = arith.addf %59, %64 : vector<128x1xf32>
    %c0_26 = arith.constant 0 : index
    %c0_27 = arith.constant 0 : index
    %66 = vector.load %arg6[%c0_26, %c0_27] : memref<128x1xf32, #tpu.memory_space<vmem>>, vector<128x1xf32>
    tpu.vector_store %arg6[%c0_26, %c0_27], %65 {strides = array<i32>} : memref<128x1xf32, #tpu.memory_space<vmem>>, vector<128x1xf32>,
    return
  }
  func.func @transform_0(%arg0: i32) -> (i32, i32) {
    %c0_i32 = arith.constant 0 : i32
    %c0_i32_0 = arith.constant 0 : i32
    return %arg0, %c0_i32 : i32, i32
  }
  func.func @transform_1(%arg0: i32) -> (i32, i32) {
    %c0_i32 = arith.constant 0 : i32
    %c0_i32_0 = arith.constant 0 : i32
    %c0_i32_1 = arith.constant 0 : i32
    return %c0_i32, %c0_i32_0 : i32, i32
  }
  func.func @transform_2(%arg0: i32) -> (i32, i32) {
    %c0_i32 = arith.constant 0 : i32
    %c0_i32_0 = arith.constant 0 : i32
    %c0_i32_1 = arith.constant 0 : i32
    return %c0_i32, %c0_i32_0 : i32, i32
  }
  func.func @transform_3(%arg0: i32) -> (i32, i32) {
    %c0_i32 = arith.constant 0 : i32
    %c0_i32_0 = arith.constant 0 : i32
    return %arg0, %c0_i32 : i32, i32
  }
  func.func @transform_4(%arg0: i32) -> (i32, i32) {
    %c0_i32 = arith.constant 0 : i32
    %c0_i32_0 = arith.constant 0 : i32
    %c0_i32_1 = arith.constant 0 : i32
    return %c0_i32, %c0_i32_0 : i32, i32
  }
  func.func @transform_5(%arg0: i32) -> (i32, i32) {
    %c0_i32 = arith.constant 0 : i32
    %c0_i32_0 = arith.constant 0 : i32
    return %arg0, %c0_i32 : i32, i32
  }
}

</mosaic_0001>

<bundles_post_ra>
// kernel: _dynamic_focal_call.1
= control target key start
LH: loop header
LB: loop body
LE: loop exit
PB: predicated region body
PF: predicated region fallthrough
CT: control target
= control target key end

     0   :  { %v1541_v1 = vmov -1e+30   ;;  %v1542_v2 = vmov 0   ;;  %v1543_v14 = vmov 1e+30   ;;  %v366_v55 = vlaneseq  ;;  %s2452_s1 = inlined_call_operand.vmem [shape: bf16[128,128], index: 1, kind: input, shape index: {}, may-alias: {0,1}]   ;;  %s2453_s0 = inlined_call_operand.vmem [shape: bf16[128,128], index: 0, kind: input, shape index: {}, may-alias: {0,1}]   ;;  %s2454_s3 = inlined_call_operand.vmem [shape: s32[128,1], index: 3, kind: input, shape index: {}]   ;;  %s2455_s2 = inlined_call_operand.vmem [shape: f32[1,128], index: 2, kind: input, shape index: {}]   ;;  %s2456_s5 = inlined_call_operand.vmem [shape: f32[128,1], index: 5, kind: output, shape index: {}]   ;;  %s2457_s4 = inlined_call_operand.vmem [shape: s32[1,128], index: 4, kind: input, shape index: {}]  }
   0x1   :  { %v1396_v0 = vld [vmem:[%s2452_s1] sm:$0xff]   ;;  %602 = vmax.xlane.f32.xlu1 %v1541_v1  ;;  %1395 = vset.pattern.permute.xlu0 %v1542_v2  ;;  %v1397_v3 = vld [vmem:[%s2452_s1 + $0x8] sm:$0xff]   ;;  %v1398_v4 = vld [vmem:[%s2452_s1 + $0x10] sm:$0xff]  }
   0x2   :  { %1343 = vmatprep.subr.bf16.mxu0 %v1396_v0  ;;  %1375 = vmatprep.subr.bf16.mxu1 %v1396_v0  ;;  %v21_v5 = vld [vmem:[%s2453_s0] sm:$0xff]   ;;  %v1399_v8 = vld [vmem:[%s2452_s1 + $0x18] sm:$0xff]   ;;  %v1401_v10 = vld [vmem:[%s2452_s1 + $0x28] sm:$0xff]   ;;  %v1745_v2 = vshrl.u32 %v366_v55, 7 }
   0x3   :  { %1344 = vmatpush3.bf16.xpose.msra.mxu0 %v1396_v0  ;;  %1383 = vmatpush3.bf16.xpose.msra.mxu1 %v1396_v0  ;;  %v246_v6 = vunpack.c.l.bf16 %v21_v5  ;;  %v1400_v9 = vld [vmem:[%s2452_s1 + $0x20] sm:$0xff]   ;;  %v1402_v12 = vld [vmem:[%s2452_s1 + $0x30] sm:$0xff]   ;;  %v1403_v13 = vld [vmem:[%s2452_s1 + $0x38] sm:$0xff]  }
   0x4   :  { %1345 = vmatprep.subr.bf16.mxu0 %v1397_v3  ;;  %1376 = vmatprep.subr.bf16.mxu1 %v1397_v3  ;;  %v451_v11 = vld [vmem:[%s2454_s3] sm:$0xff]  ;;  %v1405_v16 = vld [vmem:[%s2453_s0 + $0x8] sm:$0xff]   ;;  %v1408_v18 = vld [vmem:[%s2453_s0 + $0x30] sm:$0xff]  }
   0x5   :  { %604 = vmax.xlane.f32.xlu1 %v1541_v1  ;;  %1359 = vmatprep.mubr.bf16.mxu0 %v21_v5  ;;  %v262_v7 = vmul.f32 %v246_v6, %v246_v6  ;;  %v1406_v15 = vld [vmem:[%s2453_s0 + $0x20] sm:$0xff]   ;;  %v1407_v17 = vld [vmem:[%s2453_s0 + $0x28] sm:$0xff]   ;;  %v1409_v19 = vld [vmem:[%s2453_s0 + $0x10] sm:$0xff]  }
   0x6   :  { %1367 = vmatprep.mubr.bf16.mxu1 %v1406_v15  ;;  %v1410_v20 = vld [vmem:[%s2453_s0 + $0x18] sm:$0xff]  }
   0x7   :  { %278 = vadd.xlane.f32.xlu0 %v262_v7  ;;  %v1411_v21 = vld [vmem:[%s2453_s0 + $0x38] sm:$0xff]  }
   0x9   :  { %606 = vmax.xlane.f32.xlu1 %v1541_v1 }
   0xb   :  { %1346 = vmatpush3.bf16.xpose.msra.mxu0 %v1397_v3  ;;  %1384 = vmatpush3.bf16.xpose.msra.mxu1 %v1397_v3  ;;  %v1747_v3 = vand.u32 127, %v366_v55 }
   0xc   :  { %1347 = vmatprep.subr.bf16.mxu0 %v1398_v4  ;;  %1377 = vmatprep.subr.bf16.mxu1 %v1398_v4 }
   0xd   :  { %608 = vmax.xlane.f32.xlu1 %v1541_v1 }
  0x11   :  { %610 = vmax.xlane.f32.xlu1 %v1541_v1 }
  0x13   :  { %1348 = vmatpush3.bf16.xpose.msra.mxu0 %v1398_v4  ;;  %1385 = vmatpush3.bf16.xpose.msra.mxu1 %v1398_v4 }
  0x14   :  { %1349 = vmatprep.subr.bf16.mxu0 %v1399_v8  ;;  %1378 = vmatprep.subr.bf16.mxu1 %v1399_v8 }
  0x15   :  { %612 = vmax.xlane.f32.xlu1 %v1541_v1 }
  0x19   :  { %614 = vmax.xlane.f32.xlu1 %v1541_v1 }
  0x1b   :  { %1350 = vmatpush3.bf16.xpose.msra.mxu0 %v1399_v8  ;;  %1386 = vmatpush3.bf16.xpose.msra.mxu1 %v1399_v8 }
  0x1c   :  { %1351 = vmatprep.subr.bf16.mxu0 %v1400_v9  ;;  %1379 = vmatprep.subr.bf16.mxu1 %v1400_v9 }
  0x1d   :  { %616 = vmax.xlane.f32.xlu1 %v1541_v1  ;;  %469 = vperm.xlu0 %1395, %v451_v11  }
  0x21   :  { %618 = vmax.xlane.f32.xlu1 %v1541_v1 }
  0x23   :  { %1352 = vmatpush3.bf16.xpose.msra.mxu0 %v1400_v9  ;;  %1387 = vmatpush3.bf16.xpose.msra.mxu1 %v1400_v9 }
  0x24   :  { %1353 = vmatprep.subr.bf16.mxu0 %v1401_v10  ;;  %1380 = vmatprep.subr.bf16.mxu1 %v1401_v10 }
  0x25   :  { %620 = vmax.xlane.f32.xlu1 %v1541_v1 }
  0x29   :  { %622 = vmax.xlane.f32.xlu1 %v1541_v1 }
  0x2b   :  { %1354 = vmatpush3.bf16.xpose.msra.mxu0 %v1401_v10  ;;  %1388 = vmatpush3.bf16.xpose.msra.mxu1 %v1401_v10 }
  0x2c   :  { %1355 = vmatprep.subr.bf16.mxu0 %v1402_v12  ;;  %1381 = vmatprep.subr.bf16.mxu1 %v1402_v12 }
  0x2d   :  { %626 = vmax.xlane.f32.xlu1 %v1541_v1 }
  0x31   :  { %628 = vmax.xlane.f32.xlu1 %v1541_v1 }
  0x33   :  { %1356 = vmatpush3.bf16.xpose.msra.mxu0 %v1402_v12  ;;  %1389 = vmatpush3.bf16.xpose.msra.mxu1 %v1402_v12 }
  0x34   :  { %1357 = vmatprep.subr.bf16.mxu0 %v1403_v13  ;;  %1382 = vmatprep.subr.bf16.mxu1 %v1403_v13 }
  0x35   :  { %630 = vmax.xlane.f32.xlu1 %v1541_v1 }
  0x39   :  { %682 = vmin.xlane.f32.xlu1 %v1543_v14 }
  0x3b   :  { %1358 = vmatpush3.bf16.xpose.msra.mxu0 %v1403_v13  ;;  %1390 = vmatpush3.bf16.xpose.msra.mxu1 %v1403_v13 }
  0x3c   :  { %624 = vmax.xlane.f32.xlu0 %v1541_v1 }
  0x3d   :  { %684 = vmin.xlane.f32.xlu1 %v1543_v14 }
  0x40   :  { %690 = vmin.xlane.f32.xlu0 %v1543_v14 }
  0x41   :  { %686 = vmin.xlane.f32.xlu1 %v1543_v14 }
  0x42   :  { %1360 = vmatmul.mubr.bf16.vlgmr.msra.gmra.mrb[0].mxu0 %v1405_v16  ;;  %1368 = vmatmul.mubr.bf16.vlgmr.msra.gmra.mrb[0].mxu1 %v1407_v17 }
  0x43   :  { %1371 = vmatprep.mubr.bf16.mxu1 %v1408_v18  ;;  %1363 = vmatprep.mubr.bf16.mxu0 %v1409_v19 }
  0x44   :  { %694 = vmin.xlane.f32.xlu0 %v1543_v14 }
  0x45   :  { %688 = vmin.xlane.f32.xlu1 %v1543_v14 }
  0x48   :  { %698 = vmin.xlane.f32.xlu0 %v1543_v14 }
  0x49   :  { %692 = vmin.xlane.f32.xlu1 %v1543_v14 }
  0x4a   :  { %1364 = vmatmul.mubr.bf16.gmra.mrb[4].mxu0 %v1410_v20  ;;  %1372 = vmatmul.mubr.bf16.gmra.mrb[4].mxu1 %v1411_v21 }
  0x4c   :  { %702 = vmin.xlane.f32.xlu0 %v1543_v14 }
  0x4d   :  { %696 = vmin.xlane.f32.xlu1 %v1543_v14 }
  0x50   :  { %706 = vmin.xlane.f32.xlu0 %v1543_v14 }
  0x51   :  { %700 = vmin.xlane.f32.xlu1 %v1543_v14 }
  0x54   :  { %710 = vmin.xlane.f32.xlu0 %v1543_v14 }
  0x55   :  { %704 = vmin.xlane.f32.xlu1 %v1543_v14 }
  0x8e   :  { %v1655_v22 = vpop.xlane.xlu1 %602 }
  0x8f   :  { %v729_v28 = vmax.f32 %v1655_v22, 1e-12  ;;  %vm713_vm1 = vcmp.gt.f32.partialorder %v1655_v22, -1e+29 }
  0x91   :  { %1413 = vrsqrt.f32 %v729_v28  ;;  %vm753_vm0 = vcmp.eq.f32.partialorder %v729_v28, inf  ;;  %vm755_vm2 = vcmp.eq.f32.partialorder %v729_v28, 0.0  ;;  %v756_v48 = vand.u32 2147483648, %v729_v28 }
  0x92   :  { %v1657_v23 = vpop.xlane.xlu1 %604 }
  0x93   :  { %v1671_v30 = vmax.f32 %v1657_v23, 1e-12  ;;  %vm714_vm5 = vcmp.gt.f32.partialorder %v1657_v23, -1e+29 }
  0x95   :  { %1415 = vrsqrt.f32 %v1671_v30  ;;  %vm760_vm3 = vcmp.eq.f32.partialorder %v1671_v30, inf  ;;  %vm762_vm6 = vcmp.eq.f32.partialorder %v1671_v30, 0.0  ;;  %v763_v56 = vand.u32 2147483648, %v1671_v30 }
  0x96   :  { %v1659_v24 = vpop.xlane.xlu1 %606 }
  0x97   :  { %v1674_v31 = vmax.f32 %v1659_v24, 1e-12  ;;  %vm715_vm10 = vcmp.gt.f32.partialorder %v1659_v24, -1e+29 }
  0x99   :  { %1417 = vrsqrt.f32 %v1674_v31  ;;  %vm767_vm4 = vcmp.eq.f32.partialorder %v1674_v31, inf  ;;  %vm769_vm8 = vcmp.eq.f32.partialorder %v1674_v31, 0.0  ;;  %v770_v59 = vand.u32 2147483648, %v1674_v31 }
  0x9a   :  { %v1661_v25 = vpop.xlane.xlu1 %608 }
  0x9b   :  { %v1677_v32 = vmax.f32 %v1661_v25, 1e-12  ;;  %v1414_v38 = vpop.eup %1413  ;;  %vm716_vm11 = vcmp.gt.f32.partialorder %v1661_v25, -1e+29 }
  0x9c   :  { %v752_v42 = vmul.f32 %v1414_v38, %v729_v28 }
  0x9d   :  { %1419 = vrsqrt.f32 %v1677_v32  ;;  %vm774_vm7 = vcmp.eq.f32.partialorder %v1677_v32, inf  ;;  %v777_v62 = vand.u32 2147483648, %v1677_v32  ;;  %vm776_vm9 = vcmp.eq.f32.partialorder %v1677_v32, 0.0 }
  0x9e   :  { %v1663_v26 = vpop.xlane.xlu1 %610  ;;  %v754_v50 = vsel %vm753_vm0, %v729_v28, %v752_v42 }
  0x9f   :  { %v1687_v35 = vmax.f32 %v1663_v26, 1e-12  ;;  %v1416_v41 = vpop.eup %1415  ;;  %v757_v57 = vsel %vm755_vm2, %v756_v48, %v754_v50  ;;  %vm717_vm12 = vcmp.gt.f32.partialorder %v1663_v26, -1e+29  ;;  %v279_v48 = vpop.xlane.xlu0 %278  ;;  %v1325_v26 = vld [vmem:[%s2455_s2] ss:$0 sm:$0xff] }
  0xa0   :  { %v759_v49 = vmul.f32 %v1416_v41, %v1671_v30  ;;  %v1751_v5 = vsel %vm713_vm1, %v757_v57, -1e+30 }
  0xa1   :  { %1421 = vrsqrt.f32 %v1687_v35  ;;  %vm781_vm13 = vcmp.eq.f32.partialorder %v1687_v35, inf  ;;  %vm783_vm14 = vcmp.eq.f32.partialorder %v1687_v35, 0.0  ;;  %v784_v11 = vand.u32 2147483648, %v1687_v35 }
  0xa2   :  { %v1665_v27 = vpop.xlane.xlu1 %612  ;;  %v761_v58 = vsel %vm760_vm3, %v1671_v30, %v759_v49 }
  0xa3   :  { %v1690_v36 = vmax.f32 %v1665_v27, 1e-12  ;;  %v1418_v45 = vpop.eup %1417  ;;  %v764_v6 = vsel %vm762_vm6, %v763_v56, %v761_v58  ;;  %vm718_vm15 = vcmp.gt.f32.partialorder %v1665_v27, -1e+29 }
  0xa4   :  { %v766_v51 = vmul.f32 %v1418_v45, %v1674_v31  ;;  %v1770_v15 = vsel %vm714_vm5, %v764_v6, -1e+30 }
  0xa5   :  { %1423 = vrsqrt.f32 %v1690_v36  ;;  %vm788_vm0 = vcmp.eq.f32.partialorder %v1690_v36, inf  ;;  %vm790_vm1 = vcmp.eq.f32.partialorder %v1690_v36, 0.0  ;;  %v791_v19 = vand.u32 2147483648, %v1690_v36 }
  0xa6   :  { %v1668_v29 = vpop.xlane.xlu1 %614  ;;  %v768_v61 = vsel %vm767_vm4, %v1674_v31, %v766_v51 }
  0xa7   :  { %v1696_v39 = vmax.f32 %v1668_v29, 1e-12  ;;  %v1420_v47 = vpop.eup %1419  ;;  %v771_v7 = vsel %vm769_vm8, %v770_v59, %v768_v61  ;;  %vm719_vm3 = vcmp.gt.f32.partialorder %v1668_v29, -1e+29  ;;  %v1842_v61 = vpop.permute.xlu0 %469 }
  0xa8   :  { %v773_v54 = vmul.f32 %v1420_v47, %v1677_v32  ;;  %v1777_v18 = vsel %vm715_vm10, %v771_v7, -1e+30 }
  0xa9   :  { %1425 = vrsqrt.f32 %v1696_v39  ;;  %vm795_vm2 = vcmp.eq.f32.partialorder %v1696_v39, inf  ;;  %vm797_vm4 = vcmp.eq.f32.partialorder %v1696_v39, 0.0  ;;  %v798_v24 = vand.u32 2147483648, %v1696_v39 }
  0xaa   :  { %v1679_v33 = vpop.xlane.xlu1 %616  ;;  %v775_v1 = vsel %vm774_vm7, %v1677_v32, %v773_v54 }
  0xab   :  { %v1699_v40 = vmax.f32 %v1679_v33, 1e-12  ;;  %v1422_v60 = vpop.eup %1421  ;;  %v778_v10 = vsel %vm776_vm9, %v777_v62, %v775_v1  ;;  %vm720_vm5 = vcmp.gt.f32.partialorder %v1679_v33, -1e+29 }
  0xac   :  { %v780_v8 = vmul.f32 %v1422_v60, %v1687_v35  ;;  %v1786_v22 = vsel %vm716_vm11, %v778_v10, -1e+30 }
  0xad   :  { %1427 = vrsqrt.f32 %v1699_v40  ;;  %vm802_vm6 = vcmp.eq.f32.partialorder %v1699_v40, inf  ;;  %vm804_vm7 = vcmp.eq.f32.partialorder %v1699_v40, 0.0  ;;  %v805_v25 = vand.u32 2147483648, %v1699_v40 }
  0xae   :  { %v1684_v34 = vpop.xlane.xlu1 %618  ;;  %v782_v23 = vsel %vm781_vm13, %v1687_v35, %v780_v8 }
  0xaf   :  { %v1703_v43 = vmax.f32 %v1684_v34, 1e-12  ;;  %v1424_v4 = vpop.eup %1423  ;;  %v785_v45 = vsel %vm783_vm14, %v784_v11, %v782_v23  ;;  %vm721_vm9 = vcmp.gt.f32.partialorder %v1684_v34, -1e+29 }
  0xb0   :  { %v787_v16 = vmul.f32 %v1424_v4, %v1690_v36  ;;  %v1837_v59 = vsel %vm717_vm12, %v785_v45, -1e+30 }
  0xb1   :  { %1429 = vrsqrt.f32 %v1703_v43  ;;  %vm809_vm8 = vcmp.eq.f32.partialorder %v1703_v43, inf  ;;  %vm811_vm10 = vcmp.eq.f32.partialorder %v1703_v43, 0.0  ;;  %v812_v50 = vand.u32 2147483648, %v1703_v43 }
  0xb2   :  { %v1692_v37 = vpop.xlane.xlu1 %620  ;;  %v789_v31 = vsel %vm788_vm0, %v1690_v36, %v787_v16 }
  0xb3   :  { %v1708_v46 = vmax.f32 %v1692_v37, 1e-12  ;;  %v1426_v9 = vpop.eup %1425  ;;  %v792_v49 = vsel %vm790_vm1, %v791_v19, %v789_v31  ;;  %vm722_vm0 = vcmp.gt.f32.partialorder %v1692_v37, -1e+29 }
  0xb4   :  { %v794_v28 = vmul.f32 %v1426_v9, %v1696_v39  ;;  %v1846_v62 = vsel %vm718_vm15, %v792_v49, -1e+30 }
  0xb5   :  { %1431 = vrsqrt.f32 %v1708_v46  ;;  %vm816_vm11 = vcmp.eq.f32.partialorder %v1708_v46, inf  ;;  %v819_v51 = vand.u32 2147483648, %v1708_v46  ;;  %vm818_vm13 = vcmp.eq.f32.partialorder %v1708_v46, 0.0 }
  0xb6   :  { %v1705_v44 = vpop.xlane.xlu1 %622  ;;  %v796_v35 = vsel %vm795_vm2, %v1696_v39, %v794_v28 }
  0xb7   :  { %v1718_v52 = vmax.f32 %v1705_v44, 1e-12  ;;  %v1428_v13 = vpop.eup %1427  ;;  %v799_v1 = vsel %vm797_vm4, %v798_v24, %v796_v35  ;;  %vm723_vm15 = vcmp.gt.f32.partialorder %v1705_v44, -1e+29 }
  0xb8   :  { %v801_v32 = vmul.f32 %v1428_v13, %v1699_v40 }
  0xb9   :  { %1433 = vrsqrt.f32 %v1718_v52  ;;  %vm823_vm14 = vcmp.eq.f32.partialorder %v1718_v52, inf  ;;  %vm825_vm12 = vcmp.eq.f32.partialorder %v1718_v52, 0.0  ;;  %v826_v27 = vand.u32 2147483648, %v1718_v52 }
  0xba   :  { %v1720_v53 = vpop.xlane.xlu1 %626  ;;  %v803_v55 = vsel %vm802_vm6, %v1699_v40, %v801_v32  ;;  %v1870_v40 = vsel %vm719_vm3, %v799_v1, -1e+30 }
  0xbb   :  { %v1739_v63 = vmax.f32 %v1720_v53, 1e-12  ;;  %v1430_v17 = vpop.eup %1429  ;;  %vm725_vm2 = vcmp.gt.f32.partialorder %v1720_v53, -1e+29 }
  0xbc   :  { %v808_v38 = vmul.f32 %v1430_v17, %v1703_v43 }
  0xbd   :  { %1435 = vrsqrt.f32 %v1739_v63  ;;  %vm837_vm1 = vcmp.eq.f32.partialorder %v1739_v63, inf  ;;  %vm839_vm4 = vcmp.eq.f32.partialorder %v1739_v63, 0.0  ;;  %v840_v17 = vand.u32 2147483648, %v1739_v63 }
  0xbe   :  { %v1741_v0 = vpop.xlane.xlu1 %628  ;;  %v810_v56 = vsel %vm809_vm8, %v1703_v43, %v808_v38  ;;  %v1872_v43 = vadd.f32 %v1325_v26, %v279_v48 }
  0xbf   :  { %v1432_v21 = vpop.eup %1431  ;;  %v813_v4 = vsel %vm811_vm10, %v812_v50, %v810_v56 }
  0xc0   :  { %v815_v47 = vmul.f32 %v1432_v21, %v1708_v46  ;;  %v1887_v13 = vsel %vm721_vm9, %v813_v4, -1e+30 }
  0xc2   :  { %v1766_v12 = vpop.xlane.xlu1 %630  ;;  %v817_v60 = vsel %vm816_vm11, %v1708_v46, %v815_v47  ;;  %v806_v46 = vsel %vm804_vm7, %v805_v25, %v803_v55 }
  0xc3   :  { %v1782_v20 = vmax.f32 %v1766_v12, 1e-12  ;;  %v1434_v42 = vpop.eup %1433  ;;  %v820_v6 = vsel %vm818_vm13, %v819_v51, %v817_v60  ;;  %v1880_v11 = vsel %vm720_vm5, %v806_v46, -1e+30 }
  0xc4   :  { %v822_v57 = vmul.f32 %v1434_v42, %v1718_v52  ;;  %v1891_v16 = vsel %vm722_vm0, %v820_v6, -1e+30 }
  0xc5   :  { %1437 = vrsqrt.f32 %v1782_v20  ;;  %vm851_vm5 = vcmp.eq.f32.partialorder %v1782_v20, inf  ;;  %vm853_vm6 = vcmp.eq.f32.partialorder %v1782_v20, 0.0  ;;  %v854_v25 = vand.u32 2147483648, %v1782_v20 }
  0xc6   :  { %v1799_v30 = vpop.xlane.xlu1 %682  ;;  %v824_v7 = vsel %vm823_vm14, %v1718_v52, %v822_v57  ;;  %vm727_vm14 = vcmp.gt.f32.partialorder %v1766_v12, -1e+29 }
  0xc7   :  { %v1807_v41 = vmax.f32 %v1799_v30, 1e-12  ;;  %v1436_v58 = vpop.eup %1435  ;;  %v827_v33 = vsel %vm825_vm12, %v826_v27, %v824_v7  ;;  %vm873_vm8 = vcmp.lt.f32.partialorder %v1799_v30, 1e+29 }
  0xc8   :  { %v836_v8 = vmul.f32 %v1436_v58, %v1739_v63  ;;  %v1916_v31 = vsel %vm723_vm15, %v827_v33, -1e+30 }
  0xc9   :  { %1439 = vrsqrt.f32 %v1807_v41  ;;  %v1876_v10 = vpop.xlane.xlu0 %624  ;;  %vm913_vm3 = vcmp.eq.f32.partialorder %v1807_v41, inf  ;;  %v916_v34 = vand.u32 2147483648, %v1807_v41  ;;  %vm915_vm7 = vcmp.eq.f32.partialorder %v1807_v41, 0.0 }
  0xca   :  { %v1825_v54 = vpop.xlane.xlu1 %684  ;;  %v838_v23 = vsel %vm837_vm1, %v1739_v63, %v836_v8  ;;  %v1948_v55 = vmax.f32 %v1876_v10, 1e-12 }
  0xcb   :  { %v1833_v36 = vmax.f32 %v1825_v54, 1e-12  ;;  %v841_v32 = vsel %vm839_vm4, %v840_v17, %v838_v23  ;;  %vm874_vm10 = vcmp.lt.f32.partialorder %v1825_v54, 1e+29 }
  0xcc   :  { %v833_v12 = vand.u32 2147483648, %v1948_v55 }
  0xcd   :  { %1441 = vrsqrt.f32 %v1833_v36  ;;  %v1908_v52 = vpop.xlane.xlu0 %690  ;;  %vm920_vm9 = vcmp.eq.f32.partialorder %v1833_v36, inf  ;;  %v923_v48 = vand.u32 2147483648, %v1833_v36  ;;  %vm922_vm11 = vcmp.eq.f32.partialorder %v1833_v36, 0.0 }
  0xce   :  { %v1861_v39 = vpop.xlane.xlu1 %686  ;;  %v1926_v30 = vmax.f32 %v1908_v52, 1e-12  ;;  %vm877_vm4 = vcmp.lt.f32.partialorder %v1908_v52, 1e+29 }
  0xcf   :  { %v1866_v9 = vmax.f32 %v1861_v39, 1e-12  ;;  %v1438_v29 = vpop.eup %1437  ;;  %vm875_vm13 = vcmp.lt.f32.partialorder %v1861_v39, 1e+29 }
  0xd0   :  { %v850_v28 = vmul.f32 %v1438_v29, %v1782_v20 }
  0xd1   :  { %1443 = vrsqrt.f32 %v1866_v9  ;;  %v1951_v53 = vpop.xlane.xlu0 %694  ;;  %vm927_vm0 = vcmp.eq.f32.partialorder %v1866_v9, inf  ;;  %v930_v58 = vand.u32 2147483648, %v1866_v9  ;;  %vm929_vm12 = vcmp.eq.f32.partialorder %v1866_v9, 0.0 }
  0xd2   :  { %v1896_v19 = vpop.xlane.xlu1 %688  ;;  %v852_v35 = vsel %vm851_vm5, %v1782_v20, %v850_v28  ;;  %v1968_v4 = vmax.f32 %v1951_v53, 1e-12  ;;  %vm943_vm5 = vcmp.eq.f32.partialorder %v1926_v30, 0.0 }
  0xd3   :  { %v1440_v21 = vpop.eup %1439  ;;  %v1902_v24 = vmax.f32 %v1896_v19, 1e-12  ;;  %vm876_vm15 = vcmp.lt.f32.partialorder %v1896_v19, 1e+29 }
  0xd4   :  { %v912_v37 = vmul.f32 %v1440_v21, %v1807_v41 }
  0xd5   :  { %1445 = vrsqrt.f32 %v1902_v24  ;;  %vm934_vm1 = vcmp.eq.f32.partialorder %v1902_v24, inf  ;;  %v937_v8 = vand.u32 2147483648, %v1902_v24  ;;  %v1989_v23 = vpop.xlane.xlu0 %698 }
  0xd6   :  { %v914_v38 = vsel %vm913_vm3, %v1807_v41, %v912_v37  ;;  %v1922_v42 = vpop.xlane.xlu1 %692  ;;  %v1936_v41 = vsel %vm725_vm2, %v841_v32, -1e+30  ;;  %1447 = vrsqrt.f32 %v1926_v30  ;;  %vm936_vm2 = vcmp.eq.f32.partialorder %v1902_v24, 0.0 }
  0xd7   :  { %v1442_v45 = vpop.eup %1441  ;;  %v917_v47 = vsel %vm915_vm7, %v916_v34, %v914_v38  ;;  %v1929_v44 = vmax.f32 %v1922_v42, 1e-12  ;;  %vm941_vm3 = vcmp.eq.f32.partialorder %v1926_v30, inf  ;;  %v944_v34 = vand.u32 2147483648, %v1926_v30 }
  0xd8   :  { %v1017_v49 = vsel %vm873_vm8, %v917_v47, 1e+30  ;;  %v919_v63 = vmul.f32 %v1442_v45, %v1833_v36  ;;  %v2006_v47 = vmax.f32 %v1989_v23, 1e-12  ;;  %vm878_vm8 = vcmp.lt.f32.partialorder %v1922_v42, 1e+29 }
  0xd9   :  { %v1942_v50 = vsub.f32 %v1751_v5, %v1017_v49  ;;  %1449 = vrsqrt.f32 %v1929_v44  ;;  %vm950_vm7 = vcmp.eq.f32.partialorder %v1929_v44, 0.0 }
  0xda   :  { %v921_v51 = vsel %vm920_vm9, %v1833_v36, %v919_v63  ;;  %v855_v36 = vsel %vm853_vm6, %v854_v25, %v852_v35  ;;  %v1970_v27 = vpop.xlane.xlu1 %696  ;;  %1451 = vrsqrt.f32 %v1948_v55  ;;  %vm948_vm6 = vcmp.eq.f32.partialorder %v1929_v44, inf }
  0xdb   :  { %v1444_v56 = vpop.eup %1443  ;;  %v1065_v57 = vand.u32 2147483647, %v1942_v50  ;;  %v924_v5 = vsel %vm922_vm11, %v923_v48, %v921_v51  ;;  %1453 = vrsqrt.f32 %v1968_v4  ;;  %v2014_v63 = vsel %vm727_vm14, %v855_v36, -1e+30 }
  0xdc   :  { %v1018_v60 = vsel %vm874_vm10, %v924_v5, 1e+30  ;;  %v926_v1 = vmul.f32 %v1444_v56, %v1866_v9  ;;  %vm830_vm9 = vcmp.eq.f32.partialorder %v1948_v55, inf  ;;  %vm879_vm10 = vcmp.lt.f32.partialorder %v1951_v53, 1e+29 }
  0xdd   :  { %v1081_v26 = vsub.f32 0.0, %v1065_v57  ;;  %v1964_v46 = vsub.f32 %v1770_v15, %v1018_v60  ;;  %vm955_vm11 = vcmp.eq.f32.partialorder %v1968_v4, inf  ;;  %vm880_vm14 = vcmp.lt.f32.partialorder %v1970_v27, 1e+29 }
  0xde   :  { %v928_v20 = vsel %vm927_vm0, %v1866_v9, %v926_v1  ;;  %v1983_v9 = vmax.f32 %v1970_v27, 1e-12  ;;  %v1049_v1 = vmax.f32 %v1942_v50, 0.0 }
  0xdf   :  { %v1446_v54 = vpop.eup %1445  ;;  %v1098_v6 = vmul.f32 1.442695, %v1081_v26  ;;  %v1066_v15 = vand.u32 2147483647, %v1964_v46  ;;  %v931_v7 = vsel %vm929_vm12, %v930_v58, %v928_v20  ;;  %vm832_vm12 = vcmp.eq.f32.partialorder %v1948_v55, 0.0 }
  0xe0   :  { %v1019_v29 = vsel %vm875_vm13, %v931_v7, 1e+30  ;;  %v933_v33 = vmul.f32 %v1446_v54, %v1902_v24  ;;  %v1448_v37 = vpop.eup %1447  ;;  %vm957_vm13 = vcmp.eq.f32.partialorder %v1968_v4, 0.0  ;;  %vm962_vm0 = vcmp.eq.f32.partialorder %v1983_v9, inf }
  0xe1   :  { %1455 = vpow2.f32 %v1098_v6  ;;  %v1082_v17 = vsub.f32 0.0, %v1066_v15  ;;  %v1986_v21 = vsub.f32 %v1777_v18, %v1019_v29  ;;  %v940_v45 = vmul.f32 %v1448_v37, %v1926_v30 }
  0xe2   :  { %v935_v39 = vsel %vm934_vm1, %v1902_v24, %v933_v33  ;;  %1457 = vrsqrt.f32 %v1983_v9  ;;  %v951_v24 = vand.u32 2147483648, %v1929_v44  ;;  %vm881_vm1 = vcmp.lt.f32.partialorder %v1989_v23, 1e+29 }
  0xe3   :  { %v1100_v28 = vmul.f32 1.442695, %v1082_v17  ;;  %v1067_v25 = vand.u32 2147483647, %v1986_v21  ;;  %v938_v18 = vsel %vm936_vm2, %v937_v8, %v935_v39  ;;  %v1450_v32 = vpop.eup %1449  ;;  %v942_v19 = vsel %vm941_vm3, %v1926_v30, %v940_v45 }
  0xe4   :  { %v1020_v38 = vsel %vm876_vm15, %v938_v18, 1e+30  ;;  %v947_v35 = vmul.f32 %v1450_v32, %v1929_v44  ;;  %v1452_v57 = vpop.eup %1451  ;;  %v965_v17 = vand.u32 2147483648, %v1983_v9  ;;  %v1050_v18 = vmax.f32 %v1964_v46, 0.0 }
  0xe5   :  { %1459 = vpow2.f32 %v1100_v28  ;;  %v1083_v48 = vsub.f32 0.0, %v1067_v25  ;;  %v2009_v49 = vsub.f32 %v1786_v22, %v1020_v38  ;;  %v945_v22 = vsel %vm943_vm5, %v944_v34, %v942_v19  ;;  %v1454_v60 = vpop.eup %1453 }
  0xe6   :  { %v1021_v5 = vsel %vm877_vm4, %v945_v22, 1e+30  ;;  %v949_v58 = vsel %vm948_vm6, %v1929_v44, %v947_v35  ;;  %1461 = vrsqrt.f32 %v2006_v47  ;;  %v954_v15 = vmul.f32 %v1454_v60, %v1968_v4 }
  0xe7   :  { %v1102_v51 = vmul.f32 1.442695, %v1083_v48  ;;  %v1068_v56 = vand.u32 2147483647, %v2009_v49  ;;  %v2034_v30 = vsub.f32 %v1837_v59, %v1021_v5  ;;  %v952_v42 = vsel %vm950_vm7, %v951_v24, %v949_v58  ;;  %v2085_v58 = vpop.xlane.xlu1 %700 }
  0xe8   :  { %v1022_v26 = vsel %vm878_vm8, %v952_v42, 1e+30  ;;  %v958_v59 = vand.u32 2147483648, %v1968_v4  ;;  %v956_v33 = vsel %vm955_vm11, %v1968_v4, %v954_v15  ;;  %v829_v38 = vmul.f32 %v1452_v57, %v1948_v55 }
  0xe9   :  { %1463 = vpow2.f32 %v1102_v51  ;;  %v1084_v36 = vsub.f32 0.0, %v1068_v56  ;;  %v1069_v20 = vand.u32 2147483647, %v2034_v30  ;;  %v2043_v54 = vsub.f32 %v1846_v62, %v1022_v26 }
  0xea   :  { %v959_v28 = vsel %vm957_vm13, %v958_v59, %v956_v33  ;;  %vm964_vm15 = vcmp.eq.f32.partialorder %v1983_v9, 0.0  ;;  %vm969_vm2 = vcmp.eq.f32.partialorder %v2006_v47, inf  ;;  %vm1288_vm4 = vcmask 7168  }
  0xeb   :  { %v2039_v52 = vpop.eup %1455  ;;  %v1104_v44 = vmul.f32 1.442695, %v1084_v36  ;;  %v1085_v7 = vsub.f32 0.0, %v1069_v20  ;;  %v1070_v8 = vand.u32 2147483647, %v2043_v54  ;;  %v831_v5 = vsel %vm830_vm9, %v1948_v55, %v829_v38 }
  0xec   :  { %v1137_v6 = vadd.f32 1.0, %v2039_v52  ;;  %v1458_v29 = vpop.eup %1457  ;;  %v1140_v62 = vmul.f32 -0.5, %v2039_v52  ;;  %v1023_v45 = vsel %vm879_vm10, %v959_v28, 1e+30  ;;  %v1143_v57 = vand.u32 2147483647, %v2039_v52 }
  0xed   :  { %1465 = vpow2.f32 %v1104_v44  ;;  %v1106_v34 = vmul.f32 1.442695, %v1085_v7  ;;  %v1086_v37 = vsub.f32 0.0, %v1070_v8  ;;  %v961_v25 = vmul.f32 %v1458_v29, %v1983_v9 }
  0xee   :  { %1467 = vlog2.f32 %v1137_v6  ;;  %v2073_v35 = vsub.f32 %v1870_v40, %v1023_v45  ;;  %v1141_v56 = vadd.f32 1.0, %v1140_v62  ;;  %v972_v40 = vand.u32 2147483648, %v2006_v47 }
  0xef   :  { %v2058_v39 = vpop.eup %1459  ;;  %1469 = vpow2.f32 %v1106_v34  ;;  %v1108_v4 = vmul.f32 1.442695, %v1086_v37  ;;  %v963_v48 = vsel %vm962_vm0, %v1983_v9, %v961_v25  ;;  %vm971_vm3 = vcmp.eq.f32.partialorder %v2006_v47, 0.0  ;;  %v2115_v25 = vpop.xlane.xlu0 %702 }
  0xf0   :  { %v1146_v32 = vadd.f32 1.0, %v2058_v39  ;;  %v1462_v24 = vpop.eup %1461  ;;  %v1149_v19 = vmul.f32 -0.5, %v2058_v39  ;;  %v966_v53 = vsel %vm964_vm15, %v965_v17, %v963_v48  ;;  %v1071_v36 = vand.u32 2147483647, %v2073_v35 }
  0xf1   :  { %v968_v22 = vmul.f32 %v1462_v24, %v2006_v47  ;;  %v1024_v42 = vsel %vm880_vm14, %v966_v53, 1e+30  ;;  %v1051_v44 = vmax.f32 %v1986_v21, 0.0  ;;  %v1142_v6 = vmul.f32 %v2039_v52, %v1141_v56 }
  0xf2   :  { %1471 = vlog2.f32 %v1146_v32  ;;  %v1150_v26 = vadd.f32 1.0, %v1149_v19  ;;  %v2094_v20 = vsub.f32 %v1880_v11, %v1024_v42  ;;  %v1087_v7 = vsub.f32 0.0, %v1071_v36 }
  0xf3   :  { %v2076_v51 = vpop.eup %1463  ;;  %1473 = vpow2.f32 %v1108_v4  ;;  %v970_v60 = vsel %vm969_vm2, %v2006_v47, %v968_v22  ;;  %v2099_v27 = vmax.f32 %v2085_v58, 1e-12  ;;  %vm2101_vm5 = vcmp.lt.f32.partialorder %v1143_v57, 0.0004427343 }
  0xf4   :  { %v1155_v9 = vadd.f32 1.0, %v2076_v51  ;;  %v1158_v15 = vmul.f32 -0.5, %v2076_v51  ;;  %v1152_v47 = vand.u32 2147483647, %v2058_v39  ;;  %v973_v33 = vsel %vm971_vm3, %v972_v40, %v970_v60 }
  0xf5   :  { %v2110_v52 = vsel %vm832_vm12, %v833_v12, %v831_v5  ;;  %v1110_v17 = vmul.f32 1.442695, %v1087_v7  ;;  %v1151_v34 = vmul.f32 %v2058_v39, %v1150_v26  ;;  %v1072_v28 = vand.u32 2147483647, %v2094_v20  ;;  %v2153_v26 = vpop.xlane.xlu0 %706 }
  0xf6   :  { %1475 = vlog2.f32 %v1155_v9  ;;  %v1159_v4 = vadd.f32 1.0, %v1158_v15  ;;  %v1025_v55 = vsel %vm881_vm1, %v973_v33, 1e+30  ;;  %vm2125_vm6 = vcmp.lt.f32.partialorder %v1152_v47, 0.0004427343 }
  0xf7   :  { %v1466_v59 = vpop.eup %1465  ;;  %1477 = vrsqrt.f32 %v2099_v27  ;;  %v1161_v48 = vand.u32 2147483647, %v2076_v51  ;;  %v1052_v53 = vmax.f32 %v2009_v49, 0.0  ;;  %v1088_v23 = vsub.f32 0.0, %v1072_v28 }
  0xf8   :  { %v1468_v8 = vpop.eup %1467  ;;  %v1164_v62 = vadd.f32 1.0, %v1466_v59  ;;  %v1167_v37 = vmul.f32 -0.5, %v1466_v59  ;;  %v1170_v22 = vand.u32 2147483647, %v1466_v59  ;;  %v2140_v57 = vsub.f32 %v1887_v13, %v1025_v55  ;;  %v2195_v55 = vld [vmem:[%s2457_s4] ss:$0 sm:$0xff] }
  0xf9   :  { %v1139_v11 = vmul.f32 0.6931472, %v1468_v8  ;;  %v2117_v32 = vpop.eup %1469  ;;  %v1160_v5 = vmul.f32 %v2076_v51, %v1159_v4  ;;  %v1112_v40 = vmul.f32 1.442695, %v1088_v23  ;;  %vm2148_vm7 = vcmp.lt.f32.partialorder %v1161_v48, 0.0004427343  ;;  %v2209_v23 = vpop.xlane.xlu0 %710 }
  0xfa   :  { %1479 = vlog2.f32 %v1164_v62  ;;  %v1173_v24 = vadd.f32 1.0, %v2117_v32  ;;  %v1168_v50 = vadd.f32 1.0, %v1167_v37  ;;  %v1176_v49 = vmul.f32 -0.5, %v2117_v32 }
  0xfb   :  { %v1145_v38 = vsel %vm2101_vm5, %v1142_v6, %v1139_v11  ;;  %1481 = vpow2.f32 %v1110_v17  ;;  %vm2155_vm8 = vcmp.lt.f32.partialorder %v1170_v22, 0.0004427343  ;;  %v1053_v51 = vmax.f32 %v2034_v30, 0.0 }
  0xfc   :  { %v1472_v12 = vpop.eup %1471  ;;  %v1273_v39 = vadd.f32 %v1145_v38, %v1049_v1  ;;  %1483 = vlog2.f32 %v1173_v24  ;;  %v1169_v46 = vmul.f32 %v1466_v59, %v1168_v50  ;;  %v1073_v7 = vand.u32 2147483647, %v2140_v57 }
  0xfd   :  { %v2131_v19 = vpop.eup %1473  ;;  %v1148_v56 = vmul.f32 0.6931472, %v1472_v12  ;;  %vm976_vm9 = vcmp.eq.f32.partialorder %v2099_v27, inf  ;;  %v1177_v47 = vadd.f32 1.0, %v1176_v49  ;;  %v2170_v30 = vmax.f32 %v2115_v25, 1e-12 }
  0xfe   :  { %1290 = vst.msk [vmem:[%s2456_s5 + $0x8] sm:$0xff] %vm1288_vm4, %v1273_v39  ;;  %v1182_v1 = vadd.f32 1.0, %v2131_v19  ;;  %v1185_v13 = vmul.f32 -0.5, %v2131_v19  ;;  %v2173_v62 = vmax.f32 %v2153_v26, 1e-12  ;;  %v1089_v17 = vsub.f32 0.0, %v1073_v7 }
  0xff   :  { %v1154_v9 = vsel %vm2125_vm6, %v1151_v34, %v1148_v56  ;;  %vm882_vm10 = vcmp.lt.f32.partialorder %v2085_v58, 1e+29  ;;  %v979_v38 = vand.u32 2147483648, %v2099_v27  ;;  %v1188_v21 = vand.u32 2147483647, %v2131_v19 }
 0x100   :  { %v1476_v36 = vpop.eup %1475  ;;  %v1274_v42 = vadd.f32 %v1154_v9, %v1050_v18  ;;  %1485 = vlog2.f32 %v1182_v1  ;;  %v1179_v18 = vand.u32 2147483647, %v2117_v32  ;;  %v1186_v11 = vadd.f32 1.0, %v1185_v13 }
 0x101   :  { %v1157_v6 = vmul.f32 0.6931472, %v1476_v36  ;;  %1487 = vpow2.f32 %v1112_v40  ;;  %v1478_v8 = vpop.eup %1477  ;;  %v1114_v4 = vmul.f32 1.442695, %v1089_v17  ;;  %vm978_vm11 = vcmp.eq.f32.partialorder %v2099_v27, 0.0 }
 0x102   :  { %1291 = vst.msk [vmem:[%s2456_s5 + $0x10] sm:$0xff] %vm1288_vm4, %v1274_v42  ;;  %v975_v34 = vmul.f32 %v1478_v8, %v2099_v27  ;;  %1489 = vrsqrt.f32 %v2170_v30  ;;  %vm402_vm13 = vcmp.eq.s32.totalorder %v1745_v2, %v1747_v3  ;;  %v1178_v39 = vmul.f32 %v2117_v32, %v1177_v47 }
 0x103   :  { %v1163_v29 = vsel %vm2148_vm7, %v1160_v5, %v1157_v6  ;;  %1491 = vrsqrt.f32 %v2173_v62  ;;  %vm2204_vm14 = vcmp.lt.f32.partialorder %v1179_v18, 0.0004427343  ;;  %v1187_v22 = vmul.f32 %v2131_v19, %v1186_v11 }
 0x104   :  { %v1480_v33 = vpop.eup %1479  ;;  %v1275_v59 = vadd.f32 %v1163_v29, %v1051_v44  ;;  %v977_v45 = vsel %vm976_vm9, %v2099_v27, %v975_v34  ;;  %vm520_vm0 = vcmp.eq.s32.totalorder %v1842_v61, %v2195_v55  ;;  %v1054_v19 = vmax.f32 %v2043_v54, 0.0 }
 0x105   :  { %v2178_v37 = vpop.eup %1481  ;;  %v1166_v28 = vmul.f32 0.6931472, %v1480_v33  ;;  %v980_v1 = vsel %vm978_vm11, %v979_v38, %v977_v45  ;;  %vm2221_vm12 = vcmp.lt.f32.partialorder %v1188_v21, 0.0004427343  ;;  %v1055_v5 = vmax.f32 %v2073_v35, 0.0 }
 0x106   :  { %1292 = vst.msk [vmem:[%s2456_s5 + $0x18] sm:$0xff] %vm1288_vm4, %v1275_v59  ;;  %v1191_v44 = vadd.f32 1.0, %v2178_v37  ;;  %v1484_v48 = vpop.eup %1483  ;;  %v1194_v32 = vmul.f32 -0.5, %v2178_v37  ;;  %v1026_v27 = vsel %vm882_vm10, %v980_v1, 1e+30  ;;  %vm434_vm1 = vcmp.lt.s32.totalorder %v1747_v3, 8 }
 0x107   :  { %v1172_v12 = vsel %vm2155_vm8, %v1169_v46, %v1166_v28  ;;  %v1175_v50 = vmul.f32 0.6931472, %v1484_v48  ;;  %v2233_v42 = vsub.f32 %v1891_v16, %v1026_v27  ;;  %v2236_v54 = vmax.f32 %v2209_v23, 1e-12  ;;  %v2246_v16 = vpop.xlane.xlu1 %704 }
 0x108   :  { %v1276_v24 = vadd.f32 %v1172_v12, %v1052_v53  ;;  %1493 = vlog2.f32 %v1191_v44  ;;  %v1197_v13 = vand.u32 2147483647, %v2178_v37  ;;  %vm883_vm15 = vcmp.lt.f32.partialorder %v2115_v25, 1e+29 }
 0x109   :  { %1495 = vpow2.f32 %v1114_v4  ;;  %v1181_v40 = vsel %vm2204_vm14, %v1178_v39, %v1175_v50  ;;  %v1195_v6 = vadd.f32 1.0, %v1194_v32  ;;  %v1074_v15 = vand.u32 2147483647, %v2233_v42 }
 0x10a   :  { %v1486_v9 = vpop.eup %1485  ;;  %1293 = vst.msk [vmem:[%s2456_s5 + $0x20] sm:$0xff] %vm1288_vm4, %v1276_v24  ;;  %v1277_v60 = vadd.f32 %v1181_v40, %v1053_v51  ;;  %1497 = vrsqrt.f32 %v2236_v54  ;;  %v1056_v46 = vmax.f32 %v2094_v20, 0.0  ;;  %vm885_vm2 = vcmp.lt.f32.partialorder %v2153_v26, 1e+29 }
 0x10b   :  { %v2228_v49 = vpop.eup %1487  ;;  %v1184_v36 = vmul.f32 0.6931472, %v1486_v9  ;;  %v1090_v8 = vsub.f32 0.0, %v1074_v15  ;;  %vm983_vm3 = vcmp.eq.f32.partialorder %v2170_v30, inf  ;;  %v986_v29 = vand.u32 2147483648, %v2170_v30 }
 0x10c   :  { %v1200_v35 = vadd.f32 1.0, %v2228_v49  ;;  %1294 = vst.msk [vmem:[%s2456_s5 + $0x28] sm:$0xff] %vm1288_vm4, %v1277_v60  ;;  %v1490_v18 = vpop.eup %1489  ;;  %v1203_v7 = vmul.f32 -0.5, %v2228_v49  ;;  %vm2261_vm5 = vcmp.lt.f32.partialorder %v1197_v13, 0.0004427343  ;;  %vm985_vm6 = vcmp.eq.f32.partialorder %v2170_v30, 0.0 }
 0x10d   :  { %v1190_v58 = vsel %vm2221_vm12, %v1187_v22, %v1184_v36  ;;  %v982_v33 = vmul.f32 %v1490_v18, %v2170_v30  ;;  %v2268_v59 = vmax.f32 %v2246_v16, 1e-12  ;;  %v1492_v11 = vpop.eup %1491  ;;  %v1196_v17 = vmul.f32 %v2178_v37, %v1195_v6 }
 0x10e   :  { %v1278_v51 = vadd.f32 %v1190_v58, %v1054_v19  ;;  %1499 = vlog2.f32 %v1200_v35  ;;  %v1206_v34 = vand.u32 2147483647, %v2228_v49  ;;  %v1116_v28 = vmul.f32 1.442695, %v1090_v8 }
 0x10f   :  { %vm997_vm7 = vcmp.eq.f32.partialorder %v2173_v62, inf  ;;  %vm1544_vm8 = vmmov 1   ;;  %v984_v44 = vsel %vm983_vm3, %v2170_v30, %v982_v33  ;;  %v996_v37 = vmul.f32 %v1492_v11, %v2173_v62 }
 0x110   :  { %1295 = vst.msk [vmem:[%s2456_s5 + $0x30] sm:$0xff] %vm1288_vm4, %v1278_v51  ;;  %vm2277_vm9 = vmxor %vm402_vm13, %vm1544_vm8  ;;  %v1000_v4 = vand.u32 2147483648, %v2173_v62  ;;  %1501 = vrsqrt.f32 %v2268_v59  ;;  %vm724_vm10 = vcmp.gt.f32.partialorder %v1876_v10, -1e+29  ;;  %v1204_v2 = vadd.f32 1.0, %v1203_v7 }
 0x111   :  { %1503 = vpow2.f32 %v1116_v28  ;;  %v987_v45 = vsel %vm985_vm6, %v986_v29, %v984_v44  ;;  %vm999_vm11 = vcmp.eq.f32.partialorder %v2173_v62, 0.0  ;;  %vm887_vm13 = vcmp.lt.f32.partialorder %v2209_v23, 1e+29  ;;  %vm2302_vm14 = vmand %vm520_vm0, %vm2277_vm9 }
 0x112   :  { %v1494_v38 = vpop.eup %1493  ;;  %v1027_v24 = vsel %vm883_vm15, %v987_v45, 1e+30  ;;  %vm2308_vm12 = vcmp.lt.f32.partialorder %v1206_v34, 0.0004427343  ;;  %v998_v50 = vsel %vm997_vm7, %v2173_v62, %v996_v37  ;;  %vm2322_vm15 = vmxor %vm520_vm0, %vm1544_vm8  ;;  %vm1011_vm3 = vcmp.eq.f32.partialorder %v2236_v54, inf }
 0x113   :  { %v2287_v12 = vpop.eup %1495  ;;  %v1193_v39 = vmul.f32 0.6931472, %v1494_v38  ;;  %v2313_v25 = vsub.f32 %v1916_v31, %v1027_v24  ;;  %v1205_v53 = vmul.f32 %v2228_v49, %v1204_v2  ;;  %v1001_v61 = vsel %vm999_vm11, %v1000_v4, %v998_v50  ;;  %vm2337_vm0 = vmand %vm2302_vm14, %vm434_vm1 }
 0x114   :  { %v1209_v48 = vadd.f32 1.0, %v2287_v12  ;;  %v1498_v31 = vpop.eup %1497  ;;  %v1212_v27 = vmul.f32 -0.5, %v2287_v12  ;;  %v1029_v62 = vsel %vm885_vm2, %v1001_v61, 1e+30  ;;  %v1014_v13 = vand.u32 2147483648, %v2236_v54  ;;  %vm2353_vm6 = vmand %vm2322_vm15, %vm434_vm1 }
 0x115   :  { %v1199_v30 = vsel %vm2261_vm5, %v1196_v17, %v1193_v39  ;;  %v1361_v32 = vpop.f32.mrb[0].mxu0  ;;  %vm1013_vm5 = vcmp.eq.f32.partialorder %v2236_v54, 0.0  ;;  %v1075_v40 = vand.u32 2147483647, %v2313_v25  ;;  %v1010_v49 = vmul.f32 %v1498_v31, %v2236_v54  ;;  %v1369_v35 = vpop.f32.mrb[0].mxu1 }
 0x116   :  { %v1279_v9 = vadd.f32 %v1199_v30, %v1055_v5  ;;  %1505 = vlog2.f32 %v1209_v48  ;;  %v183_v19 = vpop.f32.mrb[1].mxu0  ;;  %v2358_v18 = vsub.f32 %v1936_v41, %v1029_v62  ;;  %vm990_vm2 = vcmp.eq.f32.partialorder %v2268_v59, inf  ;;  %v215_v26 = vpop.f32.mrb[1].mxu1 }
 0x117   :  { %v333_v36 = vmul.f32 2.0, %v183_v19  ;;  %v1362_v60 = vpop.f32.mrb[2].mxu0  ;;  %v1091_v51 = vsub.f32 0.0, %v1075_v40  ;;  %v1215_v8 = vand.u32 2147483647, %v2287_v12  ;;  %v1012_v3 = vsel %vm1011_vm3, %v2236_v54, %v1010_v49  ;;  %v1370_v47 = vpop.f32.mrb[2].mxu1 }
 0x118   :  { %v1500_v55 = vpop.eup %1499  ;;  %1296 = vst.msk [vmem:[%s2456_s5 + $0x38] sm:$0xff] %vm1288_vm4, %v1279_v9  ;;  %v186_v58 = vpop.f32.mrb[3].mxu0  ;;  %v993_v29 = vand.u32 2147483648, %v2268_v59  ;;  %v1213_v11 = vadd.f32 1.0, %v1212_v27  ;;  %v1077_v17 = vand.u32 2147483647, %v2358_v18  ;;  %v1015_v44 = vsel %vm1013_vm5, %v1014_v13, %v1012_v3 }
 0x119   :  { %v1202_v15 = vmul.f32 0.6931472, %v1500_v55  ;;  %v349_v7 = vsub.f32 %v1872_v43, %v333_v36  ;;  %v1118_v41 = vmul.f32 1.442695, %v1091_v51  ;;  %v218_v34 = vpop.f32.mrb[3].mxu1  ;;  %vm992_vm1 = vcmp.eq.f32.partialorder %v2268_v59, 0.0 }
 0x11a   :  { %v1502_v28 = vpop.eup %1501  ;;  %v1093_v4 = vsub.f32 0.0, %v1077_v17  ;;  %v1031_v39 = vsel %vm887_vm13, %v1015_v44, 1e+30  ;;  %v868_v45 = vsel %vm724_vm10, %v2110_v52, -1e+30  ;;  %v1214_v23 = vmul.f32 %v2287_v12, %v1213_v11 }
 0x11b   :  { %v1208_v33 = vsel %vm2308_vm12, %v1205_v53, %v1202_v15  ;;  %v584_v43 = vsel %vm2337_vm0, %v349_v7, -1e+30  ;;  %v664_v38 = vsel %vm2353_vm6, %v349_v7, 1e+30  ;;  %v1504_v37 = vpop.eup %1503  ;;  %1507 = vpow2.f32 %v1118_v41 }
 0x11c   :  { %v1280_v21 = vadd.f32 %v1208_v33, %v1056_v46  ;;  %600 = vmax.xlane.f32.xlu1 %v584_v43  ;;  %v989_v2 = vmul.f32 %v1502_v28, %v2268_v59  ;;  %v1218_v20 = vadd.f32 1.0, %v1504_v37  ;;  %v2389_v54 = vsub.f32 %v2014_v63, %v1031_v39 }
 0x11d   :  { %v1365_v46 = vpop.f32.mrb[4].mxu0  ;;  %v1122_v48 = vmul.f32 1.442695, %v1093_v4  ;;  %vm884_vm7 = vcmp.lt.f32.partialorder %v2246_v16, 1e+29  ;;  %v1057_v56 = vmax.f32 %v2140_v57, 0.0 }
 0x11e   :  { %1297 = vst.msk [vmem:[%s2456_s5 + $0x40] sm:$0xff] %vm1288_vm4, %v1280_v21  ;;  %v991_v10 = vsel %vm990_vm2, %v2268_v59, %v989_v2  ;;  %v199_v52 = vpop.f32.mrb[5].mxu0  ;;  %vm2398_vm8 = vcmp.lt.f32.partialorder %v1215_v8, 0.0004427343  ;;  %1509 = vlog2.f32 %v1218_v20  ;;  %v1221_v63 = vmul.f32 -0.5, %v1504_v37  ;;  %v1373_v22 = vpop.f32.mrb[4].mxu1 }
 0x11f   :  { %v1366_v50 = vpop.f32.mrb[6].mxu0  ;;  %1511 = vpow2.f32 %v1122_v48  ;;  %v1079_v32 = vand.u32 2147483647, %v2389_v54  ;;  %v994_v1 = vsel %vm992_vm1, %v993_v29, %v991_v10  ;;  %v231_v9 = vpop.f32.mrb[5].mxu1  ;;  %v1224_v16 = vand.u32 2147483647, %v1504_v37 }
 0x120   :  { %v1506_v24 = vpop.eup %1505  ;;  %680 = vmin.xlane.f32.xlu1 %v664_v38  ;;  %v202_v31 = vpop.f32.mrb[7].mxu0  ;;  %v1028_v57 = vsel %vm884_vm7, %v994_v1, 1e+30  ;;  %v1222_v36 = vadd.f32 1.0, %v1221_v63  ;;  %v1058_v6 = vmax.f32 %v2233_v42, 0.0  ;;  %v1059_v34 = vmax.f32 %v2313_v25, 0.0 }
 0x121   :  { %v1211_v12 = vmul.f32 0.6931472, %v1506_v24  ;;  %v1374_v19 = vpop.f32.mrb[6].mxu1  ;;  %v1095_v27 = vsub.f32 0.0, %v1079_v32  ;;  %v2409_v40 = vsub.f32 %v868_v45, %v1028_v57  ;;  %vm1225_vm9 = vcmp.lt.f32.partialorder %v1224_v16, 0.0004427343 }
 0x122   :  { %v234_v61 = vpop.f32.mrb[7].mxu1  ;;  %v1223_v13 = vmul.f32 %v1504_v37, %v1222_v36  ;;  %v1061_v45 = vmax.f32 %v2358_v18, 0.0  ;;  %v1063_v18 = vmax.f32 %v2389_v54, 0.0  ;;  %v742_v54 = vmax.f32 %v1741_v0, 1e-12 }
 0x123   :  { %v1217_v53 = vsel %vm2398_vm8, %v1214_v23, %v1211_v12  ;;  %v1126_v60 = vmul.f32 1.442695, %v1095_v27  ;;  %v1076_v59 = vand.u32 2147483647, %v2409_v40  ;;  %v1060_v1 = vmax.f32 %v2409_v40, 0.0 }
 0x124   :  { %v1281_v55 = vadd.f32 %v1217_v53, %v1057_v56  ;;  %708 = vmin.xlane.f32.xlu1 %v1543_v14  ;;  %vm844_vm15 = vcmp.eq.f32.partialorder %v742_v54, inf  ;;  %vm846_vm0 = vcmp.eq.f32.partialorder %v742_v54, 0.0  ;;  %vm726_vm7 = vcmp.gt.f32.partialorder %v1741_v0, -1e+29 }
 0x125   :  { %v1508_v5 = vpop.eup %1507  ;;  %1513 = vpow2.f32 %v1126_v60  ;;  %v1092_v62 = vsub.f32 0.0, %v1076_v59 }
 0x126   :  { %1298 = vst.msk [vmem:[%s2456_s5 + $0x48] sm:$0xff] %vm1288_vm4, %v1281_v55  ;;  %v1227_v49 = vadd.f32 1.0, %v1508_v5  ;;  %v1230_v51 = vmul.f32 -0.5, %v1508_v5  ;;  %v1233_v47 = vand.u32 2147483647, %v1508_v5 }
 0x127   :  { %v1120_v35 = vmul.f32 1.442695, %v1092_v62 }
 0x128   :  { %v1510_v58 = vpop.eup %1509  ;;  %1515 = vlog2.f32 %v1227_v49  ;;  %v1231_v3 = vadd.f32 1.0, %v1230_v51  ;;  %vm1234_vm10 = vcmp.lt.f32.partialorder %v1233_v47, 0.0004427343 }
 0x129   :  { %v1512_v14 = vpop.eup %1511  ;;  %v1220_v15 = vmul.f32 0.6931472, %v1510_v58  ;;  %1517 = vpow2.f32 %v1120_v35  ;;  %v847_v35 = vand.u32 2147483648, %v742_v54 }
 0x12a   :  { %v1245_v26 = vadd.f32 1.0, %v1512_v14  ;;  %v1248_v29 = vmul.f32 -0.5, %v1512_v14  ;;  %v1232_v11 = vmul.f32 %v1508_v5, %v1231_v3  ;;  %v1251_v28 = vand.u32 2147483647, %v1512_v14 }
 0x12b   :  { %v1226_v7 = vsel %vm1225_vm9, %v1223_v13, %v1220_v15 }
 0x12c   :  { %v1282_v8 = vadd.f32 %v1226_v7, %v1058_v6  ;;  %1519 = vlog2.f32 %v1245_v26  ;;  %v1249_v41 = vadd.f32 1.0, %v1248_v29  ;;  %vm1252_vm11 = vcmp.lt.f32.partialorder %v1251_v28, 0.0004427343 }
 0x12e   :  { %1299 = vst.msk [vmem:[%s2456_s5 + $0x50] sm:$0xff] %vm1288_vm4, %v1282_v8  ;;  %v1250_v4 = vmul.f32 %v1512_v14, %v1249_v41 }
 0x12f   :  { %v1514_v33 = vpop.eup %1513 }
 0x130   :  { %v1263_v42 = vadd.f32 1.0, %v1514_v33  ;;  %v1266_v21 = vmul.f32 -0.5, %v1514_v33  ;;  %v1269_v25 = vand.u32 2147483647, %v1514_v33 }
 0x132   :  { %v1516_v17 = vpop.eup %1515  ;;  %1521 = vlog2.f32 %v1263_v42  ;;  %v1267_v46 = vadd.f32 1.0, %v1266_v21  ;;  %vm1270_vm13 = vcmp.lt.f32.partialorder %v1269_v25, 0.0004427343 }
 0x133   :  { %v1518_v43 = vpop.eup %1517  ;;  %v1229_v38 = vmul.f32 0.6931472, %v1516_v17 }
 0x134   :  { %v1236_v44 = vadd.f32 1.0, %v1518_v43  ;;  %v1239_v23 = vmul.f32 -0.5, %v1518_v43  ;;  %v1268_v52 = vmul.f32 %v1514_v33, %v1267_v46  ;;  %v1242_v30 = vand.u32 2147483647, %v1518_v43 }
 0x135   :  { %v1235_v37 = vsel %vm1234_vm10, %v1232_v11, %v1229_v38 }
 0x136   :  { %v1520_v39 = vpop.eup %1519  ;;  %v1283_v2 = vadd.f32 %v1235_v37, %v1059_v34  ;;  %1523 = vlog2.f32 %v1236_v44  ;;  %v1240_v24 = vadd.f32 1.0, %v1239_v23  ;;  %vm1243_vm14 = vcmp.lt.f32.partialorder %v1242_v30, 0.0004427343 }
 0x137   :  { %v1247_v20 = vmul.f32 0.6931472, %v1520_v39  ;;  %1525 = vrsqrt.f32 %v742_v54 }
 0x138   :  { %1300 = vst.msk [vmem:[%s2456_s5 + $0x58] sm:$0xff] %vm1288_vm4, %v1283_v2  ;;  %v1241_v50 = vmul.f32 %v1518_v43, %v1240_v24 }
 0x139   :  { %v1253_v48 = vsel %vm1252_vm11, %v1250_v4, %v1247_v20 }
 0x13a   :  { %v1285_v10 = vadd.f32 %v1253_v48, %v1061_v45 }
 0x13c   :  { %v1522_v56 = vpop.eup %1521  ;;  %1302 = vst.msk [vmem:[%s2456_s5 + $0x68] sm:$0xff] %vm1288_vm4, %v1285_v10 }
 0x13d   :  { %v1265_v63 = vmul.f32 0.6931472, %v1522_v56 }
 0x13f   :  { %v1271_v22 = vsel %vm1270_vm13, %v1268_v52, %v1265_v63 }
 0x140   :  { %v1524_v12 = vpop.eup %1523  ;;  %v1287_v32 = vadd.f32 %v1271_v22, %v1063_v18 }
 0x141   :  { %v1238_v9 = vmul.f32 0.6931472, %v1524_v12  ;;  %v1526_v36 = vpop.eup %1525 }
 0x142   :  { %1304 = vst.msk [vmem:[%s2456_s5 + $0x78] sm:$0xff] %vm1288_vm4, %v1287_v32  ;;  %v843_v16 = vmul.f32 %v1526_v36, %v742_v54 }
 0x143   :  { %v1244_v31 = vsel %vm1243_vm14, %v1241_v50, %v1238_v9 }
 0x144   :  { %v1284_v57 = vadd.f32 %v1244_v31, %v1060_v1  ;;  %v845_v14 = vsel %vm844_vm15, %v742_v54, %v843_v16 }
 0x145   :  { %v848_v29 = vsel %vm846_vm0, %v847_v35, %v845_v14 }
 0x146   :  { %1301 = vst.msk [vmem:[%s2456_s5 + $0x60] sm:$0xff] %vm1288_vm4, %v1284_v57  ;;  %v870_v17 = vsel %vm726_vm7, %v848_v29, -1e+30 }
 0x1a9   :  { %v601_v19 = vpop.xlane.xlu1 %600 }
 0x1aa   :  { %v728_v53 = vmax.f32 %v601_v19, 1e-12  ;;  %vm712_vm2 = vcmp.gt.f32.partialorder %v601_v19, -1e+29 }
 0x1ac   :  { %1527 = vrsqrt.f32 %v728_v53  ;;  %vm746_vm12 = vcmp.eq.f32.partialorder %v728_v53, inf  ;;  %v749_v49 = vand.u32 2147483648, %v728_v53  ;;  %vm748_vm3 = vcmp.eq.f32.partialorder %v728_v53, 0.0 }
 0x1ad   :  { %v681_v27 = vpop.xlane.xlu1 %680 }
 0x1ae   :  { %v888_v40 = vmax.f32 %v681_v27, 1e-12  ;;  %vm872_vm1 = vcmp.lt.f32.partialorder %v681_v27, 1e+29 }
 0x1b0   :  { %1529 = vrsqrt.f32 %v888_v40  ;;  %vm906_vm5 = vcmp.eq.f32.partialorder %v888_v40, inf  ;;  %v909_v6 = vand.u32 2147483648, %v888_v40  ;;  %vm908_vm6 = vcmp.eq.f32.partialorder %v888_v40, 0.0 }
 0x1b1   :  { %v709_v61 = vpop.xlane.xlu1 %708 }
 0x1b2   :  { %v902_v55 = vmax.f32 %v709_v61, 1e-12  ;;  %vm886_vm10 = vcmp.lt.f32.partialorder %v709_v61, 1e+29 }
 0x1b4   :  { %1531 = vrsqrt.f32 %v902_v55  ;;  %vm1004_vm8 = vcmp.eq.f32.partialorder %v902_v55, inf  ;;  %v1007_v33 = vand.u32 2147483648, %v902_v55  ;;  %vm1006_vm9 = vcmp.eq.f32.partialorder %v902_v55, 0.0 }
 0x1b6   :  { %v1528_v60 = vpop.eup %1527 }
 0x1b7   :  { %v745_v59 = vmul.f32 %v1528_v60, %v728_v53 }
 0x1b9   :  { %v747_v5 = vsel %vm746_vm12, %v728_v53, %v745_v59 }
 0x1ba   :  { %v1530_v62 = vpop.eup %1529  ;;  %v750_v58 = vsel %vm748_vm3, %v749_v49, %v747_v5 }
 0x1bb   :  { %v905_v13 = vmul.f32 %v1530_v62, %v888_v40  ;;  %v856_v7 = vsel %vm712_vm2, %v750_v58, -1e+30 }
 0x1bd   :  { %v907_v15 = vsel %vm906_vm5, %v888_v40, %v905_v13 }
 0x1be   :  { %v1532_v51 = vpop.eup %1531  ;;  %v910_v26 = vsel %vm908_vm6, %v909_v6, %v907_v15 }
 0x1bf   :  { %v1016_v8 = vsel %vm872_vm1, %v910_v26, 1e+30  ;;  %v1003_v3 = vmul.f32 %v1532_v51, %v902_v55 }
 0x1c0   :  { %v1032_v47 = vsub.f32 %v856_v7, %v1016_v8 }
 0x1c1   :  { %v1005_v42 = vsel %vm1004_vm8, %v902_v55, %v1003_v3 }
 0x1c2   :  { %v1064_v11 = vand.u32 2147483647, %v1032_v47  ;;  %v1008_v41 = vsel %vm1006_vm9, %v1007_v33, %v1005_v42  ;;  %v1048_v24 = vmax.f32 %v1032_v47, 0.0 }
 0x1c3   :  { %v1030_v34 = vsel %vm886_vm10, %v1008_v41, 1e+30 }
 0x1c4   :  { %v1080_v28 = vsub.f32 0.0, %v1064_v11  ;;  %v1046_v43 = vsub.f32 %v870_v17, %v1030_v34 }
 0x1c6   :  { %v1096_v38 = vmul.f32 1.442695, %v1080_v28  ;;  %v1078_v21 = vand.u32 2147483647, %v1046_v43  ;;  %v1062_v12 = vmax.f32 %v1046_v43, 0.0 }
 0x1c8   :  { %1533 = vpow2.f32 %v1096_v38  ;;  %v1094_v0 = vsub.f32 0.0, %v1078_v21 }
 0x1ca   :  { %v1124_v44 = vmul.f32 1.442695, %v1094_v0 }
 0x1cc   :  { %1535 = vpow2.f32 %v1124_v44 }
 0x1d2   :  { %v1534_v37 = vpop.eup %1533 }
 0x1d3   :  { %v1128_v4 = vadd.f32 1.0, %v1534_v37  ;;  %v1131_v45 = vmul.f32 -0.5, %v1534_v37  ;;  %v1134_v23 = vand.u32 2147483647, %v1534_v37 }
 0x1d5   :  { %1537 = vlog2.f32 %v1128_v4  ;;  %v1132_v20 = vadd.f32 1.0, %v1131_v45  ;;  %vm1135_vm11 = vcmp.lt.f32.partialorder %v1134_v23, 0.0004427343 }
 0x1d6   :  { %v1536_v39 = vpop.eup %1535 }
 0x1d7   :  { %v1254_v2 = vadd.f32 1.0, %v1536_v39  ;;  %v1257_v46 = vmul.f32 -0.5, %v1536_v39  ;;  %v1133_v10 = vmul.f32 %v1534_v37, %v1132_v20  ;;  %v1260_v56 = vand.u32 2147483647, %v1536_v39 }
 0x1d9   :  { %1539 = vlog2.f32 %v1254_v2  ;;  %v1258_v52 = vadd.f32 1.0, %v1257_v46  ;;  %vm1261_vm13 = vcmp.lt.f32.partialorder %v1260_v56, 0.0004427343 }
 0x1db   :  { %v1259_v50 = vmul.f32 %v1536_v39, %v1258_v52 }
 0x1df   :  { %v1538_v25 = vpop.eup %1537 }
 0x1e0   :  { %v1130_v48 = vmul.f32 0.6931472, %v1538_v25 }
 0x1e2   :  { %v1136_v18 = vsel %vm1135_vm11, %v1133_v10, %v1130_v48 }
 0x1e3   :  { %v1540_v30 = vpop.eup %1539  ;;  %v1272_v63 = vadd.f32 %v1136_v18, %v1048_v24 }
 0x1e4   :  { %v1256_v22 = vmul.f32 0.6931472, %v1540_v30 }
 0x1e5   :  { %1289 = vst.msk [vmem:[%s2456_s5] sm:$0xff] %vm1288_vm4, %v1272_v63 }
 0x1e6   :  { %v1262_v32 = vsel %vm1261_vm13, %v1259_v50, %v1256_v22 }
 0x1e7   :  { %v1286_v1 = vadd.f32 %v1262_v32, %v1062_v12 }
 0x1e9   :  { %1303 = vst.msk [vmem:[%s2456_s5 + $0x70] sm:$0xff] %vm1288_vm4, %v1286_v1 }

</bundles_post_ra>
